<compile_context>
chip_gen: v7x
topology: tpu7x:2x2x1
jax: 0.10.0
libtpu: 0.0.40
codegen_flags: <defaults>
</compile_context>

<pallas_src>
import functools

import jax
import jax.numpy as jnp
from jax.experimental import pallas as pl
from jax.experimental.pallas import tpu as pltpu


def _round_up(x, m):
    return ((x + m - 1) // m) * m


def _channel_matmul(w, x, use_mxu):
    """w: (Cout, Cin) f32, x: (Cin, T) f32 -> (Cout, T) f32."""
    if use_mxu:
        return jnp.dot(w, x, preferred_element_type=jnp.float32)
    # Tiny channel counts: the MXU systolic array would be almost entirely idle,
    # so do the contraction as Cin VPU broadcast multiply-adds instead.  The
    # per-column slices/broadcasts are trace-time unrolled (Cin of them per
    # layer per grid step) and are negligible next to the T/128 vmuls with the
    # large spatial tiles chosen below.
    cin = w.shape[1]
    acc = w[:, 0:1] * x[0:1, :]
    for k in range(1, cin):
        acc = acc + w[:, k:k + 1] * x[k:k + 1, :]
    return acc


def _basic_block_kernel(x_ref, w1_ref, b1_ref, w2_ref, b2_ref, out_ref, *,
                        residual: bool, use_mxu: bool):
    """Fused conv1x1+bn1+relu -> conv1x1+bn2 (+residual) -> relu.

    x_ref:   (1, Cin,  T)   flattened-NCHW input tile (T = spatial tile, lanes)
    w1_ref:  (Cout, Cin)    BN1-folded weights (scale1 * W1)
    b1_ref:  (Cout, 1)      BN1-folded bias
    w2_ref:  (Cout, Cout)   BN2-folded weights
    b2_ref:  (Cout, 1)      BN2-folded bias
    out_ref: (1, Cout, T)
    """
    x = x_ref[0].astype(jnp.float32)                                  # (Cin, T)
    h = _channel_matmul(w1_ref[...], x, use_mxu) + b1_ref[...]        # conv1+bn1
    h = jnp.maximum(h, 0.0)                                           # relu
    o = _channel_matmul(w2_ref[...], h, use_mxu) + b2_ref[...]        # conv2+bn2
    if residual:
        o = o + x
    o = jnp.maximum(o, 0.0)                                           # relu
    out_ref[0] = o.astype(out_ref.dtype)


def fold_bn(gamma, beta, running_mean, running_var, eps=1e-5):
    scale = gamma / jnp.sqrt(running_var + eps)
    bias = beta - running_mean * scale
    return scale, bias


def _plan_spatial(hw, n, cin, cout, *, budget_bytes=24 << 20,
                  min_total_steps=4, min_tile_lanes=1024):
    """Pick (tile, num_tiles, padded_hw) for the spatial (lane) axis.

    - `hw` is first rounded up to a multiple of 128 (lane-dense stores).
    - The tile is the largest 128-multiple such that the double-buffered
      in+out blocks (rows sublane-padded to 8, f32-conservative) fit inside
      `budget_bytes` (~24 MiB -> safe within v7x's 64 MiB physical VMEM, and
      explicitly raised past v5e's 16 MiB scoped default by the caller).
    - If the whole problem would collapse to < `min_total_steps` grid steps,
      the spatial axis is split further (down to `min_tile_lanes`) so both
      v7x TensorCores get work and DMA overlaps compute.
    """
    hw128 = _round_up(hw, 128)
    # Double-buffered (in + out) VMEM bytes per lane, rows sublane-padded to 8.
    bytes_per_lane = 2 * (_round_up(cin, 8) + _round_up(cout, 8)) * 4
    t_budget = max(128, (budget_bytes // bytes_per_lane) // 128 * 128)
    num_tiles = max(1, -(-hw128 // t_budget))
    if n * num_tiles < min_total_steps:
        want = -(-min_total_steps // n)
        cap = max(1, hw128 // max(128, min(min_tile_lanes, hw128)))
        num_tiles = max(num_tiles, min(want, cap))
    t = _round_up(-(-hw128 // num_tiles), 128)
    num_tiles = -(-hw128 // t)
    hw_pad = t * num_tiles
    return t, num_tiles, hw_pad


def basic_block_1x1_forward(x_nchw, params, *, residual=True, stride=1, eps=1e-5):
    """BasicBlock1x1 forward (inference-mode BN).  x_nchw: (N, C, H, W)."""
    if stride != 1:
        # A 1x1 conv with stride s just subsamples the spatial grid.
        # TODO(synk): fold the subsampling into the BlockSpec index_map / pl.ds
        #             stride to avoid this extra HBM pass for strided configs.
        x_nchw = x_nchw[:, :, ::stride, ::stride]
    n, cin, h, w = x_nchw.shape

    # PyTorch conv1x1 weights are (Cout, Cin, 1, 1), bias=False.
    w1 = params["w1"].reshape(params["w1"].shape[0], cin)
    cout = w1.shape[0]
    w2 = params["w2"].reshape(cout, cout)
    if residual and cin != cout:
        raise ValueError("residual add requires inplanes == planes "
                         "(downsample path not supported)")

    s1, b1 = fold_bn(params["bn1_gamma"], params["bn1_beta"],
                     params["bn1_mean"], params["bn1_var"], eps)
    s2, b2 = fold_bn(params["bn2_gamma"], params["bn2_beta"],
                     params["bn2_mean"], params["bn2_var"], eps)

    # Fold BN scale into the conv weights (exact for inference BN).
    w1f = (s1[:, None] * w1).astype(jnp.float32)
    w2f = (s2[:, None] * w2).astype(jnp.float32)
    b1f = b1.reshape(cout, 1).astype(jnp.float32)
    b2f = b2.reshape(cout, 1).astype(jnp.float32)

    hw = h * w
    t, num_tiles, hw_pad = _plan_spatial(hw, n, cin, cout)

    x2 = x_nchw.reshape(n, cin, hw)     # native NCHW, spatial flattened onto lanes
    if hw_pad != hw:
        # Keep 128-multiple lane-dense tiles (unmasked vst); padded lanes compute
        # garbage from zero input and are sliced off below.
        x2 = jnp.pad(x2, ((0, 0), (0, 0), (0, hw_pad - hw)))

    grid = (n, num_tiles)
    use_mxu = min(cin, cout) >= 8       # tiny C: VPU broadcast-MACs instead of MXU

    # Explicit VMEM ceiling: double-buffered blocks fit ~24 MiB by construction;
    # 32-48 MiB is above v5e's 16 MiB scoped default and below v7x's 64 MiB
    # physical VMEM.
    vmem_need = 2 * (_round_up(cin, 8) + _round_up(cout, 8)) * t * 4
    vmem_limit = int(min(48 << 20, max(32 << 20, vmem_need + (4 << 20))))

    kernel = functools.partial(_basic_block_kernel,
                               residual=residual, use_mxu=use_mxu)

    out = pl.pallas_call(
        kernel,
        out_shape=jax.ShapeDtypeStruct((n, cout, hw_pad), x_nchw.dtype),
        grid=grid,
        in_specs=[
            pl.BlockSpec((1, cin, t), lambda i, j: (i, 0, j)),
            pl.BlockSpec((cout, cin), lambda i, j: (0, 0)),
            pl.BlockSpec((cout, 1), lambda i, j: (0, 0)),
            pl.BlockSpec((cout, cout), lambda i, j: (0, 0)),
            pl.BlockSpec((cout, 1), lambda i, j: (0, 0)),
        ],
        out_specs=pl.BlockSpec((1, cout, t), lambda i, j: (i, 0, j)),
        compiler_params=pltpu.CompilerParams(
            dimension_semantics=("parallel", "parallel"),
            vmem_limit_bytes=vmem_limit),
    )(x2, w1f, b1f, w2f, b2f)

    if hw_pad != hw:
        out = out[:, :, :hw]
    return out.reshape(n, cout, h, w)


def _reference_forward(x_nchw, params, *, residual=True, stride=1, eps=1e-5):
    """Pure-JAX reference (lax conv, NCHW/OIHW like PyTorch) for correctness."""
    def conv(a, wgt, s):
        return jax.lax.conv_general_dilated(
            a, wgt, window_strides=(s, s), padding="VALID",
            dimension_numbers=("NCHW", "OIHW", "NCHW"))

    s1, b1 = fold_bn(params["bn1_gamma"], params["bn1_beta"],
                     params["bn1_mean"], params["bn1_var"], eps)
    s2, b2 = fold_bn(params["bn2_gamma"], params["bn2_beta"],
                     params["bn2_mean"], params["bn2_var"], eps)

    res = x_nchw[:, :, ::stride, ::stride]
    out = conv(x_nchw, params["w1"], stride)
    out = out * s1[None, :, None, None] + b1[None, :, None, None]
    out = jnp.maximum(out, 0.0)
    out = conv(out, params["w2"], 1)
    out = out * s2[None, :, None, None] + b2[None, :, None, None]
    if residual:
        out = out + res
    return jnp.maximum(out, 0.0)


if __name__ == "__main__":
    # Small shapes consistent with BasicBlock1x1(inplanes=4, planes=4, stride=1).
    N, C, H, W = 2, 4, 16, 16
    key = jax.random.PRNGKey(0)
    kx, k1, k2, kg1, kb1, kg2, kb2, km1, kv1, km2, kv2 = jax.random.split(key, 11)

    x = jax.random.normal(kx, (N, C, H, W), dtype=jnp.float32)   # NCHW input

    params = {
        # conv1x1 weights in PyTorch layout (Cout, Cin, 1, 1), bias=False.
        "w1": 0.3 * jax.random.normal(k1, (C, C, 1, 1), dtype=jnp.float32),
        "w2": 0.3 * jax.random.normal(k2, (C, C, 1, 1), dtype=jnp.float32),
        "bn1_gamma": 1.0 + 0.1 * jax.random.normal(kg1, (C,), dtype=jnp.float32),
        "bn1_beta": 0.1 * jax.random.normal(kb1, (C,), dtype=jnp.float32),
        "bn1_mean": 0.1 * jax.random.normal(km1, (C,), dtype=jnp.float32),
        "bn1_var": jnp.abs(1.0 + 0.1 * jax.random.normal(kv1, (C,), dtype=jnp.float32)),
        "bn2_gamma": 1.0 + 0.1 * jax.random.normal(kg2, (C,), dtype=jnp.float32),
        "bn2_beta": 0.1 * jax.random.normal(kb2, (C,), dtype=jnp.float32),
        "bn2_mean": 0.1 * jax.random.normal(km2, (C,), dtype=jnp.float32),
        "bn2_var": jnp.abs(1.0 + 0.1 * jax.random.normal(kv2, (C,), dtype=jnp.float32)),
    }

    out = jax.block_until_ready(basic_block_1x1_forward(x, params, residual=True))
    ref = jax.block_until_ready(_reference_forward(x, params, residual=True))

    assert out.shape == (N, C, H, W), out.shape
    err = float(jnp.max(jnp.abs(out - ref)))
    assert jnp.allclose(out, ref, atol=1e-4, rtol=1e-4), err

    print("KERNEL_OK")
</pallas_src>

<mosaic_0001>
module attributes {stable_mosaic.version = 11 : i64} {
  func.func @_basic_block_kernel(%arg0: i32, %arg1: i32, %arg2: memref<1x4x256xf32, #tpu.memory_space<vmem>>, %arg3: memref<4x4xf32, #tpu.memory_space<vmem>>, %arg4: memref<4x1xf32, #tpu.memory_space<vmem>>, %arg5: memref<4x4xf32, #tpu.memory_space<vmem>>, %arg6: memref<4x1xf32, #tpu.memory_space<vmem>>, %arg7: memref<1x4x256xf32, #tpu.memory_space<vmem>>) attributes {dimension_semantics = [#tpu.dimension_semantics<parallel>, #tpu.dimension_semantics<parallel>], iteration_bounds = array<i64: 2, 1>, scalar_prefetch = 0 : i64, scratch_operands = 0 : i64, tpu.core_type = #tpu.core_type<tc>, window_params = [{transform_indices = @transform_0, window_bounds = array<i64: 1, 4, 256>}, {pipeline_mode = #tpu.pipeline_mode<synchronous>, transform_indices = @transform_1, window_bounds = array<i64: 4, 4>}, {pipeline_mode = #tpu.pipeline_mode<synchronous>, transform_indices = @transform_2, window_bounds = array<i64: 4, 1>}, {pipeline_mode = #tpu.pipeline_mode<synchronous>, transform_indices = @transform_3, window_bounds = array<i64: 4, 4>}, {pipeline_mode = #tpu.pipeline_mode<synchronous>, transform_indices = @transform_4, window_bounds = array<i64: 4, 1>}, {transform_indices = @transform_5, window_bounds = array<i64: 1, 4, 256>}]} {
    %c0 = arith.constant 0 : index
    %c0_0 = arith.constant 0 : index
    %c0_1 = arith.constant 0 : index
    %0 = vector.load %arg2[%c0, %c0_0, %c0_1] : memref<1x4x256xf32, #tpu.memory_space<vmem>>, vector<1x4x256xf32>
    %1 = vector.shape_cast %0 : vector<1x4x256xf32> to vector<4x256xf32>
    %c0_2 = arith.constant 0 : index
    %c0_3 = arith.constant 0 : index
    %2 = vector.load %arg3[%c0_2, %c0_3] : memref<4x4xf32, #tpu.memory_space<vmem>>, vector<4x4xf32>
    %3 = vector.extract_strided_slice %2 {offsets = [0, 0], sizes = [4, 1], strides = [1, 1]} : vector<4x4xf32> to vector<4x1xf32>
    %4 = vector.extract_strided_slice %1 {offsets = [0, 0], sizes = [1, 256], strides = [1, 1]} : vector<4x256xf32> to vector<1x256xf32>
    %5 = vector.broadcast %3 : vector<4x1xf32> to vector<4x256xf32>
    %6 = vector.broadcast %4 : vector<1x256xf32> to vector<4x256xf32>
    %7 = arith.mulf %5, %6 : vector<4x256xf32>
    %8 = vector.extract_strided_slice %2 {offsets = [0, 1], sizes = [4, 1], strides = [1, 1]} : vector<4x4xf32> to vector<4x1xf32>
    %9 = vector.extract_strided_slice %1 {offsets = [1, 0], sizes = [1, 256], strides = [1, 1]} : vector<4x256xf32> to vector<1x256xf32>
    %10 = vector.broadcast %8 : vector<4x1xf32> to vector<4x256xf32>
    %11 = vector.broadcast %9 : vector<1x256xf32> to vector<4x256xf32>
    %12 = arith.mulf %10, %11 : vector<4x256xf32>
    %13 = arith.addf %7, %12 : vector<4x256xf32>
    %14 = vector.extract_strided_slice %2 {offsets = [0, 2], sizes = [4, 1], strides = [1, 1]} : vector<4x4xf32> to vector<4x1xf32>
    %15 = vector.extract_strided_slice %1 {offsets = [2, 0], sizes = [1, 256], strides = [1, 1]} : vector<4x256xf32> to vector<1x256xf32>
    %16 = vector.broadcast %14 : vector<4x1xf32> to vector<4x256xf32>
    %17 = vector.broadcast %15 : vector<1x256xf32> to vector<4x256xf32>
    %18 = arith.mulf %16, %17 : vector<4x256xf32>
    %19 = arith.addf %13, %18 : vector<4x256xf32>
    %20 = vector.extract_strided_slice %2 {offsets = [0, 3], sizes = [4, 1], strides = [1, 1]} : vector<4x4xf32> to vector<4x1xf32>
    %21 = vector.extract_strided_slice %1 {offsets = [3, 0], sizes = [1, 256], strides = [1, 1]} : vector<4x256xf32> to vector<1x256xf32>
    %22 = vector.broadcast %20 : vector<4x1xf32> to vector<4x256xf32>
    %23 = vector.broadcast %21 : vector<1x256xf32> to vector<4x256xf32>
    %24 = arith.mulf %22, %23 : vector<4x256xf32>
    %25 = arith.addf %19, %24 : vector<4x256xf32>
    %c0_4 = arith.constant 0 : index
    %c0_5 = arith.constant 0 : index
    %26 = vector.load %arg4[%c0_4, %c0_5] : memref<4x1xf32, #tpu.memory_space<vmem>>, vector<4x1xf32>
    %27 = vector.broadcast %26 : vector<4x1xf32> to vector<4x256xf32>
    %28 = arith.addf %25, %27 : vector<4x256xf32>
    %cst = arith.constant 0.000000e+00 : f32
    %29 = vector.broadcast %cst : f32 to vector<4x256xf32>
    %30 = arith.maximumf %28, %29 : vector<4x256xf32>
    %c0_6 = arith.constant 0 : index
    %c0_7 = arith.constant 0 : index
    %31 = vector.load %arg5[%c0_6, %c0_7] : memref<4x4xf32, #tpu.memory_space<vmem>>, vector<4x4xf32>
    %32 = vector.extract_strided_slice %31 {offsets = [0, 0], sizes = [4, 1], strides = [1, 1]} : vector<4x4xf32> to vector<4x1xf32>
    %33 = vector.extract_strided_slice %30 {offsets = [0, 0], sizes = [1, 256], strides = [1, 1]} : vector<4x256xf32> to vector<1x256xf32>
    %34 = vector.broadcast %32 : vector<4x1xf32> to vector<4x256xf32>
    %35 = vector.broadcast %33 : vector<1x256xf32> to vector<4x256xf32>
    %36 = arith.mulf %34, %35 : vector<4x256xf32>
    %37 = vector.extract_strided_slice %31 {offsets = [0, 1], sizes = [4, 1], strides = [1, 1]} : vector<4x4xf32> to vector<4x1xf32>
    %38 = vector.extract_strided_slice %30 {offsets = [1, 0], sizes = [1, 256], strides = [1, 1]} : vector<4x256xf32> to vector<1x256xf32>
    %39 = vector.broadcast %37 : vector<4x1xf32> to vector<4x256xf32>
    %40 = vector.broadcast %38 : vector<1x256xf32> to vector<4x256xf32>
    %41 = arith.mulf %39, %40 : vector<4x256xf32>
    %42 = arith.addf %36, %41 : vector<4x256xf32>
    %43 = vector.extract_strided_slice %31 {offsets = [0, 2], sizes = [4, 1], strides = [1, 1]} : vector<4x4xf32> to vector<4x1xf32>
    %44 = vector.extract_strided_slice %30 {offsets = [2, 0], sizes = [1, 256], strides = [1, 1]} : vector<4x256xf32> to vector<1x256xf32>
    %45 = vector.broadcast %43 : vector<4x1xf32> to vector<4x256xf32>
    %46 = vector.broadcast %44 : vector<1x256xf32> to vector<4x256xf32>
    %47 = arith.mulf %45, %46 : vector<4x256xf32>
    %48 = arith.addf %42, %47 : vector<4x256xf32>
    %49 = vector.extract_strided_slice %31 {offsets = [0, 3], sizes = [4, 1], strides = [1, 1]} : vector<4x4xf32> to vector<4x1xf32>
    %50 = vector.extract_strided_slice %30 {offsets = [3, 0], sizes = [1, 256], strides = [1, 1]} : vector<4x256xf32> to vector<1x256xf32>
    %51 = vector.broadcast %49 : vector<4x1xf32> to vector<4x256xf32>
    %52 = vector.broadcast %50 : vector<1x256xf32> to vector<4x256xf32>
    %53 = arith.mulf %51, %52 : vector<4x256xf32>
    %54 = arith.addf %48, %53 : vector<4x256xf32>
    %c0_8 = arith.constant 0 : index
    %c0_9 = arith.constant 0 : index
    %55 = vector.load %arg6[%c0_8, %c0_9] : memref<4x1xf32, #tpu.memory_space<vmem>>, vector<4x1xf32>
    %56 = vector.broadcast %55 : vector<4x1xf32> to vector<4x256xf32>
    %57 = arith.addf %54, %56 : vector<4x256xf32>
    %58 = arith.addf %57, %1 : vector<4x256xf32>
    %cst_10 = arith.constant 0.000000e+00 : f32
    %59 = vector.broadcast %cst_10 : f32 to vector<4x256xf32>
    %60 = arith.maximumf %58, %59 : vector<4x256xf32>
    %c0_11 = arith.constant 0 : index
    %c0_12 = arith.constant 0 : index
    %c0_13 = arith.constant 0 : index
    %61 = vector.load %arg7[%c0_11, %c0_12, %c0_13] : memref<1x4x256xf32, #tpu.memory_space<vmem>>, vector<1x4x256xf32>
    %62 = vector.shape_cast %61 : vector<1x4x256xf32> to vector<4x256xf32>
    %63 = vector.shape_cast %60 : vector<4x256xf32> to vector<1x4x256xf32>
    tpu.vector_store %arg7[%c0_11, %c0_12, %c0_13], %63 {strides = array<i32>} : memref<1x4x256xf32, #tpu.memory_space<vmem>>, vector<1x4x256xf32>,
    return
  }
  func.func @transform_0(%arg0: i32, %arg1: i32) -> (i32, i32, i32) {
    %c0_i32 = arith.constant 0 : i32
    %c0_i32_0 = arith.constant 0 : i32
    return %arg0, %c0_i32, %arg1 : i32, i32, i32
  }
  func.func @transform_1(%arg0: i32, %arg1: i32) -> (i32, i32) {
    %c0_i32 = arith.constant 0 : i32
    %c0_i32_0 = arith.constant 0 : i32
    %c0_i32_1 = arith.constant 0 : i32
    return %c0_i32, %c0_i32_0 : i32, i32
  }
  func.func @transform_2(%arg0: i32, %arg1: i32) -> (i32, i32) {
    %c0_i32 = arith.constant 0 : i32
    %c0_i32_0 = arith.constant 0 : i32
    %c0_i32_1 = arith.constant 0 : i32
    return %c0_i32, %c0_i32_0 : i32, i32
  }
  func.func @transform_3(%arg0: i32, %arg1: i32) -> (i32, i32) {
    %c0_i32 = arith.constant 0 : i32
    %c0_i32_0 = arith.constant 0 : i32
    %c0_i32_1 = arith.constant 0 : i32
    return %c0_i32, %c0_i32_0 : i32, i32
  }
  func.func @transform_4(%arg0: i32, %arg1: i32) -> (i32, i32) {
    %c0_i32 = arith.constant 0 : i32
    %c0_i32_0 = arith.constant 0 : i32
    %c0_i32_1 = arith.constant 0 : i32
    return %c0_i32, %c0_i32_0 : i32, i32
  }
  func.func @transform_5(%arg0: i32, %arg1: i32) -> (i32, i32, i32) {
    %c0_i32 = arith.constant 0 : i32
    %c0_i32_0 = arith.constant 0 : i32
    return %arg0, %c0_i32, %arg1 : i32, i32, i32
  }
}

</mosaic_0001>

<bundles_post_ra>
// kernel: tpu_custom_call.1
= control target key start
LH: loop header
LB: loop body
LE: loop exit
PB: predicated region body
PF: predicated region fallthrough
CT: control target
= control target key end

     0   :  { %10 = vsyncpa [#allocation3], 0  ;;  %s1017_s0 = inlined_call_operand.hbm [shape: f32[2,4,256], index: 0, kind: input, shape index: {}]   ;;  %s1018_s1 = inlined_call_operand.vmem [shape: f32[4,4], index: 1, kind: input, shape index: {}]   ;;  %s1019_s2 = inlined_call_operand.vmem [shape: f32[4,1], index: 2, kind: input, shape index: {}]   ;;  %s1020_s3 = inlined_call_operand.vmem [shape: f32[4,4], index: 3, kind: input, shape index: {}]   ;;  %s1021_s4 = inlined_call_operand.vmem [shape: f32[4,1], index: 4, kind: input, shape index: {}]   ;;  %s1022_s5 = inlined_call_operand.hbm [shape: f32[2,4,256], index: 5, kind: output, shape index: {}]  }
   0x1   :  { %12 = vsyncpa [#allocation3 + $0x1], 0 }
   0x2   :  { %13 = vsyncpa [#allocation4], 0 }
   0x3   :  { %15 = vsyncpa [#allocation4 + $0x1], 0  ;;  %s806_s18 = smov 0   ;;  %s808_s19 = smov 0  }
   0x4   :  { %s810_s20 = smov 0   ;;  %s812_s21 = smov 0  }
   0x5   :  { %s814_s22 = smov 0   ;;  %s816_s23 = smov 0  }
   0x6 LB: > { %s561_s24 = sadd.s32 4294967295, %s768_s23   ;;  %s562_s25 = sadd.s32 4294967294, %s768_s23   ;;  %s768_s23 = sphi %s816_s23, %s21_s23   ;;  %s764_s22 = sphi %s814_s22, %s1038_s22   ;;  %s760_s21 = sphi %s812_s21, %s1037_s21   ;;  %s756_s20 = sphi %s810_s20, %s1036_s20   ;;  %s752_s19 = sphi %s808_s19, %s1035_s19   ;;  %s748_s18 = sphi %s806_s18, %s1034_s18  }
   0x7   : > { %s33_s26 = sadd.s32 1, %s764_s22  ;;  %s42_s27 = sadd.s32 1, %s756_s20 }
   0x8   : > { %p35_p0 = scmp.ge.s32.totalorder %s33_s26, 2  ;;  %p49_p1 = scmp.ne.s32.totalorder %s756_s20, %s752_s19 }
   0x9   : > { %p50_p2 = scmp.eq.s32.totalorder %s768_s23, 0  ;;  %p55_p3 = scmp.ne.s32.totalorder %s752_s19, %s748_s18 }
   0xa   : > { %s1040_s26 = smov (%p35_p0, %s33_s26), 0  ;;  %p56_p5 = scmp.eq.s32.totalorder %s561_s24, 0 }
   0xb   : > { %p847_p4 = por %p50_p2, %p49_p1  ;;  %s37_s29 = ssub.s32 %s764_s22, %s1040_s26 }
   0xc   : > { %p165_p6 = scmp.eq.s32.totalorder %s561_s24, 1  ;;  %p40_p7 = scmp.eq.s32.totalorder %s37_s29, 0 }
   0xd   : > { %p853_p8 = por %p56_p5, %p55_p3  ;;  %p171_p10 = scmp.eq.s32.totalorder %s562_s25, 1 }
   0xe   : > { %p857_p9 = por %p165_p6, %p49_p1  ;;  %p590_p13 = scmp.lt.s32.totalorder %s768_s23, 2 }
   0xf   : > { %s862_s7 = scalar_select %p40_p7, %s756_s20, %s42_s27  }
  0x10   : > { %s1026_s6 = scalar_select %p857_p9, 1, 0 }
  0x11   : > { %p864_p11 = por %p171_p10, %p55_p3  ;;  %s203_s9 = sand.u32 1, %s756_s20  }
  0x12   : > { %s565_s10 = sshll.u32 %s203_s9, 3  ;;  %s576_s11 = sshll.u32 %s764_s22, 7 }
  0x13   : > { %s1027_s8 = scalar_select %p864_p11, 1, 0 }
  0x14   : > { %s875_s14 = scalar_lea.hbm %s1017_s0, %s576_s11  ;;  %s207_s15 = scalar_lea.vmem [#allocation2], %s565_s10 }
  0x15   : > { %s217_s16 = sshll.u32 %s207_s15, 4  ;;  %p881_p0 = pnand %p590_p13, %p847_p4  ;;  %s877_s16 = int_to_ptr.vmem [resolvable:$true] %s217_s16 }
  0x16   : > { %s204_s24 = scalar_lea.sflag [#allocation3], %s203_s9  ;;  %s656_s25 = scalar_lea.hbm %s875_s14, 128 }
  0x17   : > { %p657_p3 = scmp.ne.s32.totalorder %s875_s14, %s656_s25  ;;  %p658_p5 = pneg %p881_p0 }
  0x18   : > { %s661_s28 = scalar_lea.hbm %s1017_s0, 256  ;;  %p662_p4 = scmp.lt.u32.totalorder %s875_s14, %s1017_s0 }
  0x19   : > { %p659_p6 = pnand %p658_p5, %p657_p3  ;;  %p663_p10 = scmp.lt.u32.totalorder %s661_s28, %s656_s25 }
  0x1a   : > { %p665_p12 = scmp.lt.u32.totalorder %s656_s25, %s875_s14 }
  0x1b   : > { %p660_p7 = pneg %p659_p6  ;;  %p664_p13 = por %p663_p10, %p662_p4 }
  0x1d   : > { %p666_p1 = por %p665_p12, %p664_p13 }
  0x1f   : > { %p667_p2 = pnand %p666_p1, %p660_p7 }
  0x21   : > { %670 = shalt.err (!%p667_p2)
}
  0x22   : > { %s671_s9 = scalar_lea.vmem %s877_s16, 128  ;;  %s770_s12 = smov [#allocation2]  }
  0x23   : > { %p672_p3 = scmp.ne.s32.totalorder %s877_s16, %s671_s9  ;;  %s676_s13 = sshll.u32 %s770_s12, 4  ;;  %s677_s13 = int_to_ptr.vmem [resolvable:$false] %s676_s13 }
  0x24   : > { %s678_s15 = scalar_lea.vmem %s677_s13, 256  ;;  %p679_p9 = scmp.lt.s32.totalorder %s877_s16, %s677_s13 }
  0x25   : > { %p674_p6 = pnand %p672_p3, %p658_p5  ;;  %p680_p4 = scmp.lt.s32.totalorder %s678_s15, %s671_s9 }
  0x27   : > { %p675_p11 = pneg %p674_p6  ;;  %p681_p10 = por %p680_p4, %p679_p9 }
  0x29   : > { %p682_p12 = pnand %p681_p10, %p675_p11 }
  0x2b   : > { %685 = shalt.err (!%p682_p12)
}
  0x2c   : > { %585 = dma.hbm_to_vmem [thread:$0]  (!%p881_p0), %s875_s14, 128, %s877_s16, %s204_s24  }
  0x2d   : > { %p1029_p1 = scmp.lt.s32.totalorder %s768_s23, 3  ;;  %p1030_p2 = scmp.ge.s32.totalorder %s768_s23, 1 }
  0x2f   : > { %p223_p5 = pnand %p1030_p2, %p1029_p1 }
  0x30   : > { %s917_s25 = sand.u32 (!%p223_p5), 1, %s752_s19  }
  0x31   : > { %226 = sbr.rel (%p223_p5) target bundleno = 236 (0xec), region = 40  ;;  %s569_s27 = sshll.u32 (!%p223_p5), %s917_s25, 3 }
  0x32   : > { %s229_s29 = scalar_lea.sflag (!%p223_p5), [#allocation3], %s917_s25  ;;  %s923_s17 = scalar_lea.vmem (!%p223_p5), [#allocation2], %s569_s27 }
  0x38   : > { %739 = dma.done.wait (%p853_p8), %s229_s29, 128  }
  0x39   : > { %741 = vsyncadd (%p853_p8), %s229_s29, 4294967168  ;;  %v771_v0 = vmov 2   ;;  %v772_v1 = vmov 0   ;;  %v262_v2 = vld [vmem:[%s1018_s1] sm:$0xf]  ;;  %v773_v3 = vmov 3   ;;  %v269_v8 = vlaneseq }
  0x3a   : > { %646 = vset.pattern.permute.xlu1 %v771_v0  ;;  %644 = vset.pattern.permute.xlu0 %v772_v1  ;;  %v774_v4 = vmov 1   ;;  %v367_v5 = vld [vmem:[%s1019_s2] sm:$0xf]  ;;  %s577_s12 = sshll.u32 %s760_s21, 7  ;;  %s258_s13 = scalar_lea.vmem [#allocation5], %s569_s27 }
  0x3b   : > { %316 = vperm.xlu1 %646, %v262_v2   ;;  %265 = vperm.xlu0 %644, %v262_v2   ;;  %v377_v6 = vld [vmem:[%s1020_s3] sm:$0xf]  ;;  %v270_v9 = vshrl.u32 %v269_v8, 7  ;;  %s477_s15 = sshll.u32 %s258_s13, 4  ;;  %s968_s14 = scalar_lea.hbm %s1022_s5, %s577_s12  ;;  %s970_s15 = int_to_ptr.vmem [resolvable:$true] %s477_s15 }
  0x3c   : > { %v441_v7 = vld [vmem:[%s1021_s4] sm:$0xf]  ;;  %s461_s16 = scalar_lea.sflag [#allocation4], %s917_s25  ;;  %s686_s24 = scalar_lea.vmem %s970_s15, 128 }
  0x3d   : > { %v271_v10 = vsub.s32 0, %v270_v9  ;;  %v275_v11 = vsub.s32 4, %v270_v9  ;;  %v295_v12 = vsub.s32 1, %v270_v9  ;;  %v299_v13 = vsub.s32 5, %v270_v9  ;;  %v942_v14 = vld [vmem:[%s923_s17] sm:$0xff]  ;;  %p687_p8 = scmp.ne.s32.totalorder %s970_s15, %s686_s24  ;;  %p1031_p9 = scmp.ne.s32.totalorder %s1026_s6, 0 }
  0x3e   : > { %v321_v15 = vsub.s32 2, %v270_v9  ;;  %v325_v16 = vsub.s32 6, %v270_v9  ;;  %v944_v17 = vsub.s32 3, %v270_v9  ;;  %v351_v18 = vsub.s32 7, %v270_v9  ;;  %s775_s21 = smov [#allocation5]  }
  0x3f   : > { %647 = vset.pattern.permute.xlu1 %v773_v3  ;;  %645 = vset.pattern.permute.xlu0 %v774_v4  ;;  %v272_v19 = vrot.slane %v942_v14, %v271_v10  ;;  %v276_v20 = vrot.slane %v942_v14, %v275_v11  ;;  %v296_v21 = vrot.slane %v942_v14, %v295_v12  ;;  %p688_p11 = pnand %p687_p8, %p1031_p9  ;;  %s690_s27 = sshll.u32 %s775_s21, 4  ;;  %s691_s27 = int_to_ptr.vmem [resolvable:$false] %s690_s27 }
  0x40   : > { %342 = vperm.xlu1 %647, %v262_v2   ;;  %290 = vperm.xlu0 %645, %v262_v2   ;;  %v300_v22 = vrot.slane %v942_v14, %v299_v13  ;;  %v322_v25 = vrot.slane %v942_v14, %v321_v15  ;;  %v326_v26 = vrot.slane %v942_v14, %v325_v16  ;;  %s692_s28 = scalar_lea.vmem %s691_s27, 256  ;;  %p693_p7 = scmp.lt.s32.totalorder %s970_s15, %s691_s27 }
  0x41   : > { %v348_v27 = vrot.slane %v942_v14, %v944_v17  ;;  %v352_v28 = vrot.slane %v942_v14, %v351_v18  ;;  %v282_v29 = vrot.slane %v272_v19, %v271_v10  ;;  %v286_v30 = vrot.slane %v276_v20, %v271_v10  ;;  %p689_p0 = pneg %p688_p11  ;;  %p694_p13 = scmp.lt.s32.totalorder %s692_s28, %s686_s24 }
  0x42   : > { %v306_v31 = vrot.slane %v296_v21, %v295_v12  ;;  %v310_v32 = vrot.slane %v300_v22, %v295_v12  ;;  %v332_v33 = vrot.slane %v322_v25, %v321_v15  ;;  %v336_v34 = vrot.slane %v326_v26, %v321_v15 }
  0x43   : > { %v358_v37 = vrot.slane %v348_v27, %v944_v17  ;;  %v362_v38 = vrot.slane %v352_v28, %v944_v17  ;;  %v449_v22 = vcombine.high %v942_v14, %v942_v14  ;;  %p695_p3 = por %p694_p13, %p693_p7 }
  0x44   : > { %648 = vset.pattern.permute.xlu1 %v772_v1  ;;  %649 = vset.pattern.permute.xlu0 %v772_v1 }
  0x45   : > { %370 = vperm.xlu1 %648, %v367_v5   ;;  %380 = vperm.xlu0 %649, %v377_v6   ;;  %p696_p6 = pnand %p695_p3, %p689_p0 }
  0x49   : > { %650 = vset.pattern.permute.xlu1 %v774_v4  ;;  %652 = vset.pattern.permute.xlu0 %v773_v3 }
  0x4a   : > { %394 = vperm.xlu1 %650, %v377_v6   ;;  %426 = vperm.xlu0 %652, %v377_v6  }
  0x4e   : > { %651 = vset.pattern.permute.xlu1 %v771_v0  ;;  %654 = vset.pattern.permute.xlu0 %v772_v1 }
  0x4f   : > { %410 = vperm.xlu1 %651, %v377_v6  }
  0x53   : > { %653 = vset.pattern.permute.xlu1 %v772_v1 }
  0x54   : > { %444 = vperm.xlu1 %653, %v441_v7  }
  0xba   : > { %v266_v23 = vpop.permute.xlu0 %265  ;;  %v317_v24 = vpop.permute.xlu1 %316 }
  0xbb   : > { %v287_v39 = vmul.f32 %v282_v29, %v266_v23  ;;  %v288_v40 = vmul.f32 %v286_v30, %v266_v23  ;;  %v337_v43 = vmul.f32 %v332_v33, %v317_v24  ;;  %v338_v44 = vmul.f32 %v336_v34, %v317_v24 }
  0xbf   : > { %v291_v35 = vpop.permute.xlu0 %290  ;;  %v343_v36 = vpop.permute.xlu1 %342 }
  0xc0   : > { %v311_v41 = vmul.f32 %v306_v31, %v291_v35  ;;  %v312_v42 = vmul.f32 %v310_v32, %v291_v35  ;;  %v363_v47 = vmul.f32 %v358_v37, %v343_v36  ;;  %v364_v48 = vmul.f32 %v362_v38, %v343_v36 }
  0xc2   : > { %v313_v45 = vadd.f32 %v311_v41, %v287_v39  ;;  %v314_v46 = vadd.f32 %v312_v42, %v288_v40 }
  0xc4   : > { %v371_v49 = vpop.permute.xlu1 %370  ;;  %v339_v50 = vadd.f32 %v337_v43, %v313_v45  ;;  %v340_v51 = vadd.f32 %v338_v44, %v314_v46  ;;  %v381_v56 = vpop.permute.xlu0 %380 }
  0xc6   : > { %v365_v52 = vadd.f32 %v363_v47, %v339_v50  ;;  %v366_v53 = vadd.f32 %v364_v48, %v340_v51 }
  0xc8   : > { %v373_v54 = vadd.f32 %v371_v49, %v365_v52  ;;  %v374_v55 = vadd.f32 %v371_v49, %v366_v53 }
  0xc9   : > { %v395_v57 = vpop.permute.xlu1 %394  ;;  %v427_v9 = vpop.permute.xlu0 %426 }
  0xca   : > { %v375_v58 = vmax.f32 %v373_v54, 0.0  ;;  %v376_v59 = vmax.f32 %v374_v55, 0.0 }
  0xcc   : > { %v386_v60 = vrot.slane %v375_v58, %v271_v10  ;;  %v390_v61 = vrot.slane %v376_v59, %v271_v10  ;;  %v400_v62 = vrot.slane %v375_v58, %v295_v12  ;;  %v404_v63 = vrot.slane %v376_v59, %v295_v12 }
  0xcd   : > { %v432_v0 = vrot.slane %v375_v58, %v944_v17  ;;  %v436_v1 = vrot.slane %v376_v59, %v944_v17  ;;  %v416_v2 = vrot.slane %v375_v58, %v321_v15  ;;  %v420_v3 = vrot.slane %v376_v59, %v321_v15 }
  0xce   : > { %v391_v4 = vmul.f32 %v386_v60, %v381_v56  ;;  %v392_v5 = vmul.f32 %v390_v61, %v381_v56  ;;  %v405_v6 = vmul.f32 %v400_v62, %v395_v57  ;;  %v406_v7 = vmul.f32 %v404_v63, %v395_v57  ;;  %v411_v8 = vpop.permute.xlu1 %410 }
  0xcf   : > { %v421_v11 = vmul.f32 %v416_v2, %v411_v8  ;;  %v422_v13 = vmul.f32 %v420_v3, %v411_v8  ;;  %v437_v18 = vmul.f32 %v432_v0, %v427_v9  ;;  %v438_v12 = vmul.f32 %v436_v1, %v427_v9 }
  0xd0   : > { %v407_v16 = vadd.f32 %v405_v6, %v391_v4  ;;  %v408_v10 = vadd.f32 %v406_v7, %v392_v5 }
  0xd2   : > { %v423_v19 = vadd.f32 %v421_v11, %v407_v16  ;;  %v424_v20 = vadd.f32 %v422_v13, %v408_v10 }
  0xd3   : > { %v445_v21 = vpop.permute.xlu1 %444 }
  0xd4   : > { %v439_v17 = vadd.f32 %v437_v18, %v423_v19  ;;  %v440_v15 = vadd.f32 %v438_v12, %v424_v20 }
  0xd6   : > { %v447_v23 = vadd.f32 %v445_v21, %v439_v17  ;;  %v448_v24 = vadd.f32 %v445_v21, %v440_v15 }
  0xd8   : > { %v451_v25 = vadd.f32 %v447_v23, %v942_v14  ;;  %v452_v26 = vadd.f32 %v449_v22, %v448_v24 }
  0xda   : > { %v453_v27 = vmax.f32 %v451_v25, 0.0  ;;  %v454_v28 = vmax.f32 %v452_v26, 0.0 }
  0xdc   : > { %v457_v29 = vcombine.low %v453_v27, %v454_v28 }
  0xde   : > { %459 = vst [vmem:[%s258_s13] sm:$0xff] %v457_v29 }
  0xdf   : > { %699 = shalt.err (!%p696_p6)
}
  0xe0   : > { %s700_s25 = scalar_lea.hbm %s968_s14, 128  ;;  %s704_s11 = scalar_lea.hbm %s1022_s5, 256 }
  0xe1   : > { %p701_p4 = scmp.ne.s32.totalorder %s968_s14, %s700_s25  ;;  %p705_p1 = scmp.lt.u32.totalorder %s968_s14, %s1022_s5 }
  0xe2   : > { %p706_p2 = scmp.lt.u32.totalorder %s704_s11, %s700_s25  ;;  %p708_p8 = scmp.lt.u32.totalorder %s700_s25, %s968_s14 }
  0xe3   : > { %p702_p10 = pnand %p701_p4, %p1031_p9 }
  0xe4   : > { %p707_p5 = por %p706_p2, %p705_p1 }
  0xe5   : > { %p703_p12 = pneg %p702_p10 }
  0xe6   : > { %p709_p11 = por %p708_p8, %p707_p5 }
  0xe8   : > { %p710_p0 = pnand %p709_p11, %p703_p12 }
  0xea   : > { %713 = shalt.err (!%p710_p0)
}
  0xeb   : > { %580 = dma.vmem_to_hbm [thread:$0]  (%p1031_p9), %s970_s15, 128, %s968_s14, %s461_s16  }
  0xec PF: > { %s489_s13 = sand.u32 1, %s748_s18   ;;  %p1032_p7 = scmp.ne.s32.totalorder %s1027_s8, 0 }
  0xed   : > { %p1033_p13 = scmp.ge.s32.totalorder %s768_s23, 2  ;;  %s490_s29 = scalar_lea.sflag [#allocation4], %s489_s13 }
  0xef   : > { %p587_p3 = pnand %p1033_p13, %p1032_p7 }
  0xf1   : > { %743 = dma.done.wait (!%p587_p3), %s490_s29, 128  }
  0xf2   : > { %745 = vsyncadd (!%p587_p3), %s490_s29, 4294967168  ;;  %s21_s23 = sadd.s32 1, %s768_s23   ;;  %s1034_s18 = smov %s752_s19 }
  0xf3   : > { %p18_p6 = scmp.ge.s32.totalorder %s21_s23, 4   ;;  %s1035_s19 = smov %s756_s20 }
  0xf4   : > { %s1036_s20 = smov %s862_s7  ;;  %s1037_s21 = smov %s764_s22 }
  0xf5   : > { %s1038_s22 = smov %s1040_s26  ;;  %20 = sbr.rel (!%p18_p6) target bundleno = 6 (0x6), region = 85 }
  0xfc   :  { %495 = vsyncpa [#allocation3], 1 }
  0xfd   :  { %497 = vsyncpa [#allocation3 + $0x1], 1 }
  0xfe   :  { %498 = vsyncpa [#allocation4], 1 }
  0xff   :  { %500 = vsyncpa [#allocation4 + $0x1], 1 }

</bundles_post_ra>
